<compile_context>
chip_gen: v7x
topology: tpu7x:2x2x1
jax: 0.10.0
libtpu: 0.0.40
codegen_flags: <defaults>
</compile_context>

<pallas_src>
import functools

import jax
import jax.numpy as jnp
from jax.experimental import pallas as pl
from jax.experimental.pallas import tpu as pltpu

HIDDEN = 128                 # feature width (fixed by the module)
FUSED = 2 * HIDDEN           # fused advantage|value hidden width = 256
ROW_ALIGN = 16               # bf16 sublane-pack tile is (16, 128): keep slices tile-aligned
SLAB_DTYPE = jnp.bfloat16
MAX_SINGLE_BLOCK_ROWS = 4096 # ~2 KB live/row -> ~8 MB, safe on v5e/v6e/v7x scoped VMEM


def _round_up(n, m):
    return (n + m - 1) // m * m


# ---------------------------------------------------------------------------
# Parameter packing (done once, outside the kernel).
# ---------------------------------------------------------------------------
def pack_params(params, num_inputs, num_outputs):
    """Fuse + pad the 10 raw weights/biases into ONE compact bf16 slab.

    Slab layout, shape (ROWS, 256), all regions 16-row / 128-lane aligned:
      rows [0, NI_PAD)               cols [0,128) : W1   (extra rows zero)
      rows [WH_OFF, WH_OFF+128)      cols [0,256) : W_h  = [Wa1 | Wv1]
      rows [WO_OFF, WO_OFF+NP)       cols [0,256) : W_oc (compact transposed output,
                                                    value stream folded in, see below)
      row  BIAS_OFF                  cols [0,128) : b1
      row  BIAS_OFF                  cols [128,128+NP) : b_oc
      row  BIAS_OFF+1                cols [0,256) : [ba1 | bv1]
    """
    (w1, b1, wa1, ba1, wa2, ba2, wv1, bv1, wv2, bv2) = params
    nout = num_outputs
    assert 1 <= nout and nout + 1 <= HIDDEN, "layout requires 1 <= num_outputs <= 127"

    ni_pad = _round_up(num_inputs, ROW_ALIGN)
    np_rows = _round_up(nout + 1, ROW_ALIGN)      # advantage cols + 1 value-cancel col

    W1_OFF = 0
    WH_OFF = ni_pad
    WO_OFF = WH_OFF + HIDDEN
    BIAS_OFF = WO_OFF + np_rows
    rows = BIAS_OFF + ROW_ALIGN

    # feature layer
    w1_p = jnp.zeros((ni_pad, HIDDEN), jnp.float32).at[:num_inputs, :].set(w1)

    # fused advantage|value hidden layer
    w_h = jnp.concatenate([wa1, wv1], axis=1)                          # (128, 256)
    b_h = jnp.concatenate([ba1.reshape(-1), bv1.reshape(-1)])          # (256,)

    # Compact transposed output layer with the value stream folded in:
    #   row j < nout : [ Wa2[:, j]^T | Wv2^T ]        bias  ba2[j] + bv2
    #   row  nout    : [ 0           | -nout*Wv2^T ]  bias -nout*bv2
    # so av[:, j] = a[:, j] + v,  av[:, nout] = -nout*v,  padded rows give 0,
    # hence sum(av) == sum(a) and out = av - sum(av)/(B*nout).
    wv2_row = wv2.reshape(1, HIDDEN)                                   # Wv2^T
    bv2_s = bv2.reshape(-1)[0]
    w_oc = jnp.zeros((np_rows, FUSED), jnp.float32)
    w_oc = w_oc.at[:nout, :HIDDEN].set(wa2.T)
    w_oc = w_oc.at[:nout, HIDDEN:].set(jnp.broadcast_to(wv2_row, (nout, HIDDEN)))
    w_oc = w_oc.at[nout, HIDDEN:].set(-float(nout) * wv2.reshape(-1))
    b_oc = jnp.zeros((np_rows,), jnp.float32)
    b_oc = b_oc.at[:nout].set(ba2.reshape(-1) + bv2_s)
    b_oc = b_oc.at[nout].set(-float(nout) * bv2_s)

    slab = jnp.zeros((rows, FUSED), jnp.float32)
    slab = slab.at[W1_OFF:W1_OFF + ni_pad, :HIDDEN].set(w1_p)
    slab = slab.at[WH_OFF:WH_OFF + HIDDEN, :].set(w_h)
    slab = slab.at[WO_OFF:WO_OFF + np_rows, :].set(w_oc)
    slab = slab.at[BIAS_OFF, :HIDDEN].set(b1.reshape(-1))
    slab = slab.at[BIAS_OFF, HIDDEN:HIDDEN + np_rows].set(b_oc)
    slab = slab.at[BIAS_OFF + 1, :].set(b_h)
    slab = slab.astype(SLAB_DTYPE)

    layout = dict(num_inputs=num_inputs, num_outputs=num_outputs,
                  ni_pad=ni_pad, np_rows=np_rows,
                  W1_OFF=W1_OFF, WH_OFF=WH_OFF, WO_OFF=WO_OFF, BIAS_OFF=BIAS_OFF)
    return slab, layout


# ---------------------------------------------------------------------------
# Kernel.
# ---------------------------------------------------------------------------
def _dueling_kernel(x_ref, slab_ref, out_ref, *, layout, batch):
    ni_pad = layout["ni_pad"]
    np_rows = layout["np_rows"]
    nout = layout["num_outputs"]
    WH_OFF, WO_OFF, BIAS_OFF = layout["WH_OFF"], layout["WO_OFF"], layout["BIAS_OFF"]
    f32 = jnp.float32
    bf16 = jnp.bfloat16

    xb = x_ref[...].astype(bf16)                                        # (B, ni_pad)

    # feature: Linear + ReLU (bf16 x bf16 -> f32 accumulate)
    w1 = slab_ref[0:ni_pad, 0:HIDDEN]                                   # (ni_pad, 128) bf16
    b1 = slab_ref[BIAS_OFF:BIAS_OFF + 1, 0:HIDDEN].astype(f32)          # (1, 128)
    h = jnp.dot(xb, w1, preferred_element_type=f32) + b1
    h = jnp.maximum(h, 0.0)                                             # (B, 128) f32

    # fused advantage/value hidden: one (128, 256) matmul + ReLU
    w_h = slab_ref[WH_OFF:WH_OFF + HIDDEN, :]                           # (128, 256) bf16
    b_h = slab_ref[BIAS_OFF + 1:BIAS_OFF + 2, :].astype(f32)            # (1, 256)
    h2 = jnp.dot(h.astype(bf16), w_h, preferred_element_type=f32) + b_h
    h2 = jnp.maximum(h2, 0.0)                                           # (B, 256) f32

    # compact transposed output layer (value folded in): contract dim 1 of both
    w_oc = slab_ref[WO_OFF:WO_OFF + np_rows, :]                         # (NP, 256) bf16
    b_oc = slab_ref[BIAS_OFF:BIAS_OFF + 1,
                    HIDDEN:HIDDEN + np_rows].astype(f32)                # (1, NP)
    av = jax.lax.dot_general(
        h2.astype(bf16), w_oc,
        dimension_numbers=(((1,), (1,)), ((), ())),
        preferred_element_type=f32) + b_oc                              # (B, NP)

    # sum(av) == sum(advantage) by construction (value columns cancel, pads are 0).
    out_ref[...] = av - jnp.sum(av) * (1.0 / (batch * nout))


# ---------------------------------------------------------------------------
# Wrapper.
# ---------------------------------------------------------------------------
def dueling_dqn_forward(x, slab, layout):
    batch = x.shape[0]
    ni, ni_pad = layout["num_inputs"], layout["ni_pad"]
    nout, np_rows = layout["num_outputs"], layout["np_rows"]

    # TODO(synk): for batches beyond the single-VMEM-block ceiling, add a 1-D
    # batch grid with the slab block pinned at (0, 0) plus a second tiny pass
    # for the global advantage mean (the mean couples all rows / all cores).
    assert batch <= MAX_SINGLE_BLOCK_ROWS, (
        f"batch={batch} exceeds single-block VMEM budget ({MAX_SINGLE_BLOCK_ROWS} rows)")

    x = x.astype(jnp.float32)
    if ni_pad != ni:
        x = jnp.pad(x, ((0, 0), (0, ni_pad - ni)))

    kernel = functools.partial(_dueling_kernel, layout=layout, batch=batch)
    vmem = pl.BlockSpec(memory_space=pltpu.MemorySpace.VMEM)
    out_padded = pl.pallas_call(
        kernel,
        out_shape=jax.ShapeDtypeStruct((batch, np_rows), jnp.float32),
        in_specs=[vmem, vmem],
        out_specs=vmem,
    )(x, slab)
    return out_padded[:, :nout]


# ---------------------------------------------------------------------------
# Reference (pure JAX) and init mirroring PyTorch nn.Linear defaults.
# ---------------------------------------------------------------------------
def init_linear(key, fan_in, fan_out):
    kw, kb = jax.random.split(key)
    bound = 1.0 / jnp.sqrt(jnp.float32(fan_in))
    w = jax.random.uniform(kw, (fan_in, fan_out), jnp.float32, -bound, bound)
    b = jax.random.uniform(kb, (1, fan_out), jnp.float32, -bound, bound)
    return w, b


def reference_forward(x, params):
    (w1, b1, wa1, ba1, wa2, ba2, wv1, bv1, wv2, bv2) = params
    h = jax.nn.relu(x @ w1 + b1)
    a = jax.nn.relu(h @ wa1 + ba1) @ wa2 + ba2
    v = jax.nn.relu(h @ wv1 + bv1) @ wv2 + bv2
    return v + a - jnp.mean(a)


if __name__ == "__main__":
    num_inputs = 32
    num_outputs = 16

    key = jax.random.PRNGKey(0)
    k_x, k_xb, k1, k2, k3, k4, k5 = jax.random.split(key, 7)

    w1, b1 = init_linear(k1, num_inputs, HIDDEN)        # feature
    wa1, ba1 = init_linear(k2, HIDDEN, HIDDEN)          # advantage hidden
    wa2, ba2 = init_linear(k3, HIDDEN, num_outputs)     # advantage out
    wv1, bv1 = init_linear(k4, HIDDEN, HIDDEN)          # value hidden
    wv2, bv2 = init_linear(k5, HIDDEN, 1)               # value out
    params = (w1, b1, wa1, ba1, wa2, ba2, wv1, bv1, wv2, bv2)

    slab, layout = pack_params(params, num_inputs, num_outputs)

    # Small-shape check (bf16 slab -> tolerance relaxed vs. the f32 reference).
    x = jax.random.normal(k_x, (8, num_inputs), jnp.float32)
    out = jax.block_until_ready(dueling_dqn_forward(x, slab, layout))
    ref = reference_forward(x, params)
    assert out.shape == (8, num_outputs), out.shape
    assert jnp.allclose(out, ref, atol=2e-2, rtol=2e-2), (
        f"max abs err {jnp.max(jnp.abs(out - ref))}")

    # Amortized-batch check: 512 rows share one weight-slab DMA (still one VMEM block).
    x_big = jax.random.normal(k_xb, (512, num_inputs), jnp.float32)
    out_big = jax.block_until_ready(dueling_dqn_forward(x_big, slab, layout))
    ref_big = reference_forward(x_big, params)
    assert out_big.shape == (512, num_outputs), out_big.shape
    assert jnp.allclose(out_big, ref_big, atol=2e-2, rtol=2e-2), (
        f"max abs err {jnp.max(jnp.abs(out_big - ref_big))}")

    print("KERNEL_OK")
</pallas_src>

<mosaic_0001>
module attributes {stable_mosaic.version = 11 : i64} {
  func.func @_dueling_kernel(%arg0: memref<8x32xf32, #tpu.memory_space<vmem>>, %arg1: memref<208x256xbf16, #tpu.memory_space<vmem>>, %arg2: memref<8x32xf32, #tpu.memory_space<vmem>>) attributes {dimension_semantics = [], scalar_prefetch = 0 : i64, scratch_operands = 0 : i64, tpu.core_type = #tpu.core_type<tc>} {
    %c0 = arith.constant 0 : index
    %c0_0 = arith.constant 0 : index
    %0 = vector.load %arg0[%c0, %c0_0] : memref<8x32xf32, #tpu.memory_space<vmem>>, vector<8x32xf32>
    %1 = arith.truncf %0 : vector<8x32xf32> to vector<8x32xbf16>
    %c0_1 = arith.constant 0 : index
    %c0_2 = arith.constant 0 : index
    %2 = vector.load %arg1[%c0_1, %c0_2] : memref<208x256xbf16, #tpu.memory_space<vmem>>, vector<32x128xbf16>
    %c192 = arith.constant 192 : index
    %c0_3 = arith.constant 0 : index
    %3 = vector.load %arg1[%c192, %c0_3] : memref<208x256xbf16, #tpu.memory_space<vmem>>, vector<1x128xbf16>
    %4 = arith.extf %3 : vector<1x128xbf16> to vector<1x128xf32>
    %cst = arith.constant dense<0.000000e+00> : vector<8x128xf32>
    %5 = tpu.matmul %1, %2, %cst {dimension_numbers = #tpu.dot_dimension_numbers<[1], [0], [0], [1], [0, 0, 1, 1], [], []>} : vector<8x32xbf16>, vector<32x128xbf16>, vector<8x128xf32> -> vector<8x128xf32>
    %6 = vector.broadcast %4 : vector<1x128xf32> to vector<8x128xf32>
    %7 = arith.addf %5, %6 : vector<8x128xf32>
    %cst_4 = arith.constant 0.000000e+00 : f32
    %8 = vector.broadcast %cst_4 : f32 to vector<8x128xf32>
    %9 = arith.maximumf %7, %8 : vector<8x128xf32>
    %c32 = arith.constant 32 : index
    %c0_5 = arith.constant 0 : index
    %10 = vector.load %arg1[%c32, %c0_5] : memref<208x256xbf16, #tpu.memory_space<vmem>>, vector<128x256xbf16>
    %c193 = arith.constant 193 : index
    %c0_6 = arith.constant 0 : index
    %11 = vector.load %arg1[%c193, %c0_6] : memref<208x256xbf16, #tpu.memory_space<vmem>>, vector<1x256xbf16>
    %12 = arith.extf %11 : vector<1x256xbf16> to vector<1x256xf32>
    %13 = arith.truncf %9 : vector<8x128xf32> to vector<8x128xbf16>
    %cst_7 = arith.constant dense<0.000000e+00> : vector<8x256xf32>
    %14 = tpu.matmul %13, %10, %cst_7 {dimension_numbers = #tpu.dot_dimension_numbers<[1], [0], [0], [1], [0, 0, 1, 1], [], []>} : vector<8x128xbf16>, vector<128x256xbf16>, vector<8x256xf32> -> vector<8x256xf32>
    %15 = vector.broadcast %12 : vector<1x256xf32> to vector<8x256xf32>
    %16 = arith.addf %14, %15 : vector<8x256xf32>
    %cst_8 = arith.constant 0.000000e+00 : f32
    %17 = vector.broadcast %cst_8 : f32 to vector<8x256xf32>
    %18 = arith.maximumf %16, %17 : vector<8x256xf32>
    %c160 = arith.constant 160 : index
    %c0_9 = arith.constant 0 : index
    %19 = vector.load %arg1[%c160, %c0_9] : memref<208x256xbf16, #tpu.memory_space<vmem>>, vector<32x256xbf16>
    %c192_10 = arith.constant 192 : index
    %c128 = arith.constant 128 : index
    %20 = vector.load %arg1[%c192_10, %c128] : memref<208x256xbf16, #tpu.memory_space<vmem>>, vector<1x32xbf16>
    %21 = arith.extf %20 : vector<1x32xbf16> to vector<1x32xf32>
    %22 = arith.truncf %18 : vector<8x256xf32> to vector<8x256xbf16>
    %cst_11 = arith.constant dense<0.000000e+00> : vector<8x32xf32>
    %23 = tpu.matmul %22, %19, %cst_11 {dimension_numbers = #tpu.dot_dimension_numbers<[1], [1], [0], [0], [0, 0, 1, 0], [], []>} : vector<8x256xbf16>, vector<32x256xbf16>, vector<8x32xf32> -> vector<8x32xf32>
    %24 = vector.broadcast %21 : vector<1x32xf32> to vector<8x32xf32>
    %25 = arith.addf %23, %24 : vector<8x32xf32>
    %26 = vector.shape_cast %25 : vector<8x32xf32> to vector<1x8x32xf32>
    %cst_12 = arith.constant dense<0.000000e+00> : vector<1xf32>
    %27 = vector.multi_reduction <add>, %26, %cst_12 [1, 2] : vector<1x8x32xf32> to vector<1xf32>
    %28 = vector.shape_cast %27 : vector<1xf32> to vector<1x1x1xf32>
    %29 = vector.extract %28[0, 0, 0] : f32 from vector<1x1x1xf32>
    %cst_13 = arith.constant 7.812500e-03 : f32
    %30 = arith.mulf %29, %cst_13 : f32
    %31 = vector.broadcast %30 : f32 to vector<8x32xf32>
    %32 = arith.subf %25, %31 : vector<8x32xf32>
    %c0_14 = arith.constant 0 : index
    %c0_15 = arith.constant 0 : index
    %33 = vector.load %arg2[%c0_14, %c0_15] : memref<8x32xf32, #tpu.memory_space<vmem>>, vector<8x32xf32>
    tpu.vector_store %arg2[%c0_14, %c0_15], %32 {strides = array<i32>} : memref<8x32xf32, #tpu.memory_space<vmem>>, vector<8x32xf32>,
    return
  }
}

</mosaic_0001>

<bundles_post_ra>
// kernel: tpu_custom_call.1
= control target key start
LH: loop header
LB: loop body
LE: loop exit
PB: predicated region body
PF: predicated region fallthrough
CT: control target
= control target key end

     0   :  { %7 = vsyncpa [#allocation3], 0  ;;  %s578_s0 = inlined_call_operand.hbm [shape: f32[8,32], index: 0, kind: input, shape index: {}]   ;;  %s579_s1 = inlined_call_operand.hbm [shape: bf16[208,256], index: 1, kind: input, shape index: {}]   ;;  %s580_s2 = inlined_call_operand.hbm [shape: f32[8,32], index: 2, kind: output, shape index: {}]  }
   0x1   :  { %8 = vsyncpa [#allocation6], 0 }
   0x2   :  { %9 = vsyncpa [#allocation4], 0  ;;  %s509_s9 = smov [#allocation2]   ;;  %s510_s11 = smov [#allocation5]  }
   0x3   :  { %s16_s10 = sshll.u32 %s509_s9, 4  ;;  %s25_s12 = sshll.u32 %s510_s11, 4  ;;  %s17_s10 = int_to_ptr.vmem [resolvable:$true] %s16_s10  ;;  %s532_s12 = int_to_ptr.vmem [resolvable:$true] %s25_s12 }
   0x4   :  { %s437_s15 = scalar_lea.hbm %s578_s0, 128 }
   0x5   :  { %p438_p0 = scmp.ne.s32.totalorder %s578_s0, %s437_s15  ;;  %p441_p1 = scmp.lt.u32.totalorder %s437_s15, %s578_s0 }
   0x7   :  { %p443_p2 = pnand %p441_p1, %p438_p0 }
   0x9   :  { %446 = shalt.err (!%p443_p2)
}
   0xa   :  { %s447_s20 = scalar_lea.vmem %s17_s10, 128  ;;  %p452_p4 = scmp.lt.s32.totalorder %s17_s10, %s17_s10 }
   0xb   :  { %p448_p3 = scmp.ne.s32.totalorder %s17_s10, %s447_s20  ;;  %p453_p5 = scmp.lt.s32.totalorder %s447_s20, %s447_s20 }
   0xd   :  { %p454_p6 = por %p453_p5, %p452_p4 }
   0xf   :  { %p455_p7 = pnand %p454_p6, %p448_p3 }
  0x11   :  { %458 = shalt.err (!%p455_p7)
}
  0x12   :  { %19 = dma.hbm_to_vmem [thread:$0]  %s578_s0, 128, %s17_s10, [#allocation3]  }
  0x13   :  { %s459_s25 = scalar_lea.hbm %s579_s1, 3328 }
  0x14   :  { %p460_p8 = scmp.ne.s32.totalorder %s579_s1, %s459_s25  ;;  %p463_p9 = scmp.lt.u32.totalorder %s459_s25, %s579_s1 }
  0x16   :  { %p465_p10 = pnand %p463_p9, %p460_p8 }
  0x18   :  { %468 = shalt.err (!%p465_p10)
}
  0x19   :  { %s469_s30 = scalar_lea.vmem %s532_s12, 3328  ;;  %p474_p12 = scmp.lt.s32.totalorder %s532_s12, %s532_s12 }
  0x1a   :  { %p470_p11 = scmp.ne.s32.totalorder %s532_s12, %s469_s30  ;;  %p475_p13 = scmp.lt.s32.totalorder %s469_s30, %s469_s30 }
  0x1c   :  { %p476_p0 = por %p475_p13, %p474_p12 }
  0x1e   :  { %p477_p1 = pnand %p476_p0, %p470_p11 }
  0x20   :  { %480 = shalt.err (!%p477_p1)
}
  0x21   :  { %s511_s0 = smov 128   ;;  %s512_s3 = smov 8  }
  0x22   :  { %31 = dma.hbm_to_vmem [thread:$0]  %s579_s1, 3328, %s532_s12, [#allocation6], %s511_s0, %s511_s0, %s512_s3  }
  0x23   :  { %503 = dma.done.wait [#allocation3], 128  }
  0x24   :  { %504 = vsyncadd [#allocation3], 4294967168 }
  0x25   :  { %505 = dma.done.wait [#allocation6], 3328  }
  0x26   :  { %506 = vsyncadd [#allocation6], 4294963968  ;;  %v513_v0 = vmov 0.0   ;;  %vm514_vm0 = vmmov 0   ;;  %v405_v1 = vld [vmem:[#allocation5] ss:$8 sps:$4 sm:$0xff]   ;;  %v47_v24 = vlaneseq }
  0x27   :  { %387 = vmatprep.subr.bf16.mxu0 %v513_v0  ;;  %391 = vmatprep.mubr.msk.bf16.mxu0 %vm514_vm0, %v513_v0  ;;  %v406_v2 = vld [vmem:[#allocation5 + $0x10] ss:$8 sps:$4 sm:$0xff]   ;;  %v407_v4 = vld [vmem:[#allocation5 + $0x24] ss:$8 sps:$4 sm:$0xff]   ;;  %v409_v5 = vld [vmem:[#allocation5 + $0x20] ss:$8 sps:$4 sm:$0xff]  }
  0x28   :  { %388 = vmatpush3.bf16.msra.mxu0 %v405_v1  ;;  %v39_v3 = vld [vmem:[#allocation2] sm:$0xff]  ;;  %216 = vmatprep.subr.bf16.mxu1 %v407_v4  ;;  %vm63_vm1 = vcmask 261120   ;;  %v413_v9 = vld [vmem:[#allocation5 + $0x44] ss:$8 sps:$4 sm:$0xff]   ;;  %v415_v10 = vld [vmem:[#allocation5 + $0x40] ss:$8 sps:$4 sm:$0xff]  }
  0x29   :  { %389 = vmatprep.subr.bf16.mxu0 %v513_v0  ;;  %v410_v6 = vld [vmem:[#allocation5 + $0x34] ss:$8 sps:$4 sm:$0xff]   ;;  %v40_v7 = vpack.c.bf16 %v39_v3, %v39_v3  ;;  %217 = vmatpush1.bf16.msra.mxu1 %v409_v5  ;;  %v412_v8 = vld [vmem:[#allocation5 + $0x30] ss:$8 sps:$4 sm:$0xff]   ;;  %v419_v13 = vld [vmem:[#allocation5 + $0x64] ss:$8 sps:$4 sm:$0xff]  }
  0x2a   :  { %218 = vmatprep.subr.bf16.mxu1 %v410_v6  ;;  %v416_v11 = vld [vmem:[#allocation5 + $0x54] ss:$8 sps:$4 sm:$0xff]   ;;  %v418_v12 = vld [vmem:[#allocation5 + $0x50] ss:$8 sps:$4 sm:$0xff]   ;;  %v421_v14 = vld [vmem:[#allocation5 + $0x60] ss:$8 sps:$4 sm:$0xff]  }
  0x2b   :  { %v422_v15 = vld [vmem:[#allocation5 + $0x74] ss:$8 sps:$4 sm:$0xff]   ;;  %v424_v16 = vld [vmem:[#allocation5 + $0x70] ss:$8 sps:$4 sm:$0xff]   ;;  %v425_v17 = vld [vmem:[#allocation5 + $0x84] ss:$8 sps:$4 sm:$0xff]  }
  0x2c   :  { %390 = vmatpush3.bf16.msra.mxu0 %v406_v2  ;;  %v427_v18 = vld [vmem:[#allocation5 + $0x80] ss:$8 sps:$4 sm:$0xff]   ;;  %v428_v19 = vld [vmem:[#allocation5 + $0x94] ss:$8 sps:$4 sm:$0xff]   ;;  %v430_v20 = vld [vmem:[#allocation5 + $0x90] ss:$8 sps:$4 sm:$0xff]  }
  0x2d   :  { %219 = vmatpush1.bf16.msra.mxu1 %v412_v8  ;;  %v515_v21 = vmov 0   ;;  %v431_v22 = vld [vmem:[#allocation5 + $0xa0] ss:$8 sps:$4 sm:$0xff]   ;;  %v433_v23 = vld [vmem:[#allocation5 + $0xa4] ss:$8 sps:$4 sm:$0xff]   ;;  %v48_v25 = vshrl.u32 %v47_v24, 7 }
  0x2e   :  { %220 = vmatprep.subr.bf16.mxu1 %v413_v9  ;;  %248 = vmatprep.mubr.bf16.mxu1 %v515_v21  ;;  %v45_v26 = vld [vmem:[#allocation5 + $0xc0] sm:$0x1]  ;;  %v436_v37 = vld [vmem:[#allocation5 + $0xb4] ss:$8 sps:$4 sm:$0xff]   ;;  %v434_v38 = vld [vmem:[#allocation5 + $0xb0] ss:$8 sps:$4 sm:$0xff]  }
  0x2f   :  { %392 = vmatmul.mubr.msk.bf16.vlgmr.msra.gmra.mrb[0].mxu0 %vm63_vm1, %v40_v7  ;;  %291 = vmatprep.subr.bf16.mxu0 %v433_v23  ;;  %v46_v27 = vunpack.c.l.bf16 %v45_v26  ;;  %v49_v28 = vsub.s32 0, %v48_v25  ;;  %v124_v39 = vld [vmem:[#allocation5 + $0xc0] sm:$0x11]  ;;  %v130_v41 = vsub.s32 1, %v48_v25  ;;  %s516_s7 = smov [#allocation7]  }
  0x30   :  { %v125_v40 = vunpack.c.l.bf16 %v124_v39  ;;  %v126_v42 = vunpack.c.h.bf16 %v124_v39  ;;  %v263_v55 = vld [vmem:[#allocation5 + $0xc4] sm:$0x1]  ;;  %s351_s8 = sshll.u32 %s516_s7, 4  ;;  %s352_s8 = int_to_ptr.vmem [resolvable:$true] %s351_s8 }
  0x31   :  { %221 = vmatpush1.bf16.msra.mxu1 %v415_v10  ;;  %v50_v29 = vrot.slane %v46_v27, %v49_v28  ;;  %v264_v56 = vunpack.c.l.bf16 %v263_v55  ;;  %s481_s9 = scalar_lea.vmem %s352_s8, 128  ;;  %p486_p3 = scmp.lt.s32.totalorder %s352_s8, %s352_s8 }
  0x32   :  { %222 = vmatprep.subr.bf16.mxu1 %v416_v11  ;;  %v131_v43 = vrot.slane %v125_v40, %v130_v41  ;;  %v135_v44 = vrot.slane %v126_v42, %v130_v41  ;;  %p482_p2 = scmp.ne.s32.totalorder %s352_s8, %s481_s9  ;;  %p487_p4 = scmp.lt.s32.totalorder %s481_s9, %s481_s9 }
  0x33   :  { %v270_v57 = vrot.slane %v264_v56, %v49_v28 }
  0x34   :  { %p488_p5 = por %p487_p4, %p486_p3 }
  0x35   :  { %223 = vmatpush1.bf16.msra.mxu1 %v418_v12  ;;  %292 = vmatpush1.bf16.xpose.msra.mxu0 %v431_v22 }
  0x36   :  { %224 = vmatprep.subr.bf16.mxu1 %v419_v13  ;;  %293 = vmatprep.subr.bf16.mxu0 %v436_v37  ;;  %p489_p6 = pnand %p488_p5, %p482_p2 }
  0x39   :  { %225 = vmatpush1.bf16.msra.mxu1 %v421_v14 }
  0x3a   :  { %226 = vmatprep.subr.bf16.mxu1 %v422_v15 }
  0x3d   :  { %227 = vmatpush1.bf16.msra.mxu1 %v424_v16  ;;  %294 = vmatpush1.bf16.xpose.msra.mxu0 %v434_v38 }
  0x3e   :  { %228 = vmatprep.subr.bf16.mxu1 %v425_v17 }
  0x41   :  { %229 = vmatpush1.bf16.msra.mxu1 %v427_v18 }
  0x42   :  { %230 = vmatprep.subr.bf16.mxu1 %v428_v19 }
  0x45   :  { %231 = vmatpush1.bf16.msra.mxu1 %v430_v20 }
 0x102   :  { %v101_v30 = vpop.f32.mrb[0].mxu0 }
 0x103   :  { %v102_v31 = vadd.f32 %v101_v30, %v50_v29  ;;  %v393_v32 = vpop.f32.mrb[1].mxu0 }
 0x104   :  { %v104_v33 = vpop.f32.mrb[2].mxu0 }
 0x105   :  { %v107_v34 = vmax.f32 %v102_v31, 0.0  ;;  %v394_v35 = vpop.f32.mrb[3].mxu0 }
 0x107   :  { %v127_v36 = vpack.c.bf16 %v107_v34, %v107_v34 }
 0x109   :  { %249 = vmatmul.mubr.bf16.vlgmr.msra.gmra.mrb[0].mxu1 %v127_v36 }
 0x1dc   :  { %v250_v45 = vpop.f32.mrb[0].mxu1 }
 0x1dd   :  { %v251_v46 = vadd.f32 %v250_v45, %v131_v43  ;;  %v252_v47 = vpop.f32.mrb[1].mxu1 }
 0x1de   :  { %v253_v48 = vadd.f32 %v252_v47, %v135_v44  ;;  %v254_v49 = vpop.f32.mrb[2].mxu1 }
 0x1df   :  { %v257_v50 = vmax.f32 %v251_v46, 0.0  ;;  %v255_v51 = vpop.f32.mrb[3].mxu1 }
 0x1e0   :  { %v258_v52 = vmax.f32 %v253_v48, 0.0 }
 0x1e1   :  { %v265_v54 = vpack.c.bf16 %v257_v50, %v257_v50 }
 0x1e2   :  { %v266_v53 = vpack.c.bf16 %v258_v52, %v258_v52 }
 0x1e4   :  { %323 = vmatprep.mubr.bf16.mxu0 %v266_v53 }
 0x1e5   :  { %324 = vmatmul.mubr.bf16.vlgmr.msra.gmra.mrb[4].mxu0 %v265_v54 }
 0x2b8   :  { %v325_v58 = vpop.f32.mrb[4].mxu0 }
 0x2b9   :  { %v326_v59 = vadd.f32 %v325_v58, %v270_v57  ;;  %v327_v60 = vpop.f32.mrb[5].mxu0 }
 0x2ba   :  { %v328_v61 = vpop.f32.mrb[6].mxu0 }
 0x2bb   :  { %v329_v62 = vpop.f32.mrb[7].mxu0  ;;  %v331_v63 = vsel %vm63_vm1, %v326_v59, 0.0 }
 0x2bc   :  { %332 = vadd.xlane.f32.xlu0 %v331_v63 }
 0x349   :  { %v333_v0 = vpop.xlane.xlu0 %332 }
 0x34a   :  { %v334_v1 = vrot.slane %v333_v0, 4 }
 0x34c   :  { %v335_v2 = vadd.f32 %v334_v1, %v333_v0 }
 0x34e   :  { %v336_v3 = vrot.slane %v335_v2, 2 }
 0x350   :  { %v337_v4 = vadd.f32 %v336_v3, %v335_v2 }
 0x352   :  { %v338_v5 = vrot.slane %v337_v4, 1 }
 0x354   :  { %v339_v6 = vadd.f32 %v338_v5, %v337_v4 }
 0x356   :  { %395 = vpush %v339_v6 }
 0x387   :  { %s396_s1 = spop %395 }
 0x388   :  { %s341_s6 = smul.f32 0.0078125, %s396_s1 }
 0x38a   :  { %v342_v7 = vstv %s341_s6 }
 0x38b   :  { %v343_v8 = vsub.f32 %v326_v59, %v342_v7 }
 0x38d   :  { %344 = vst.msk [vmem:[#allocation7] sm:$0xff] %vm63_vm1, %v343_v8 }
 0x38e   :  { %492 = shalt.err (!%p489_p6)
}
 0x38f   :  { %s493_s12 = scalar_lea.hbm %s580_s2, 128 }
 0x390   :  { %p494_p7 = scmp.ne.s32.totalorder %s580_s2, %s493_s12  ;;  %p497_p8 = scmp.lt.u32.totalorder %s493_s12, %s580_s2 }
 0x392   :  { %p499_p9 = pnand %p497_p8, %p494_p7 }
 0x394   :  { %502 = shalt.err (!%p499_p9)
}
 0x395   :  { %354 = dma.vmem_to_hbm [thread:$0]  %s352_s8, 128, %s580_s2, [#allocation4]  }
 0x396   :  { %507 = dma.done.wait [#allocation4], 128  }
 0x397   :  { %508 = vsyncadd [#allocation4], 4294967168 }
 0x398   :  { %358 = vsyncpa [#allocation3], 1 }
 0x399   :  { %359 = vsyncpa [#allocation6], 1 }
 0x39a   :  { %360 = vsyncpa [#allocation4], 1 }

</bundles_post_ra>
